<compile_context>
chip_gen: v7x
topology: tpu7x:2x2x1
jax: 0.10.0
libtpu: 0.0.40
codegen_flags: <defaults>
</compile_context>

<pallas_src>
import jax
import jax.numpy as jnp
from jax.experimental import pallas as pl
from jax.experimental.pallas import tpu as pltpu


def _round_up(n, m):
    return (n + m - 1) // m * m


def _bf16_elementwise_ok():
    """bf16 bias-add/ReLU only where the VALU natively supports bf16 (v6e/v7x)."""
    try:
        kind = jax.devices()[0].device_kind.lower()
    except Exception:
        return False
    return ("v6" in kind) or ("v7" in kind)


def _pick_batch_tile(B, S):
    """Largest multiple-of-128 batch tile under a conservative VMEM budget,
    preferring >= 2 grid steps so v7x's two TensorCores both get work."""
    # Per-batch-row VMEM bytes: double-buffered bf16 x column + f32 out column,
    # plus f32 accumulators and bf16 copies of h1/h2.
    per_row = 2 * 2 * S + 2 * 4 + 256 * (4 + 2) + 128 * (4 + 2)
    budget = 12 * 1024 * 1024                      # fits the 16 MiB v5e scoped default
    cap = max(128, min(4096, (budget // per_row) // 128 * 128))
    b128 = _round_up(max(B, 1), 128)
    tb = min(cap, b128)
    if b128 > 128:
        # Keep at least 2 grid steps (megacore sharding on v7x); costs <1 extra
        # pipeline step on single-TC chips, which is negligible.
        tb = min(tb, max(128, _round_up(pl.cdiv(b128, 2), 128)))
    b_pad = _round_up(max(B, 1), tb)
    return tb, b_pad


def _value_net_kernel(x_ref, w1_ref, b1_ref, w2_ref, b2_ref, w3_ref, b3_ref, o_ref):
    """One batch tile, feature-major: x (S,TB), weights (out,in), biases (out,1).
    bf16 MXU inputs with f32 accumulation; elementwise dtype follows the bias dtype
    (bf16 on v6e/v7x, f32 on v5e)."""
    x_t = x_ref[...]                                                  # (S, TB) bf16

    a1 = jnp.dot(w1_ref[...], x_t,
                 preferred_element_type=jnp.float32)                  # (256, TB) f32
    b1 = b1_ref[...]                                                  # (256, 1)
    h1 = jnp.maximum(a1.astype(b1.dtype) + b1, 0.0)                   # bias+ReLU

    a2 = jnp.dot(w2_ref[...], h1.astype(jnp.bfloat16),
                 preferred_element_type=jnp.float32)                  # (128, TB) f32
    b2 = b2_ref[...]                                                  # (128, 1)
    h2 = jnp.maximum(a2.astype(b2.dtype) + b2, 0.0)

    out = jnp.dot(w3_ref[...], h2.astype(jnp.bfloat16),
                  preferred_element_type=jnp.float32)                 # (1, TB) f32
    o_ref[...] = (out + b3_ref[0, 0]).astype(o_ref.dtype)             # lane-dense store


def value_network_forward(x, params):
    """Pallas forward pass. x: (B, state_dim) or (state_dim,). Returns (B, 1) f32."""
    w1, b1, w2, b2, w3, b3 = params
    if x.ndim == 1:
        x = x[None, :]                     # mimic torch unsqueeze(0)
    B, S = x.shape
    h1_dim = w1.shape[1]                   # 256
    h2_dim = w2.shape[1]                   # 128

    ew_dtype = jnp.bfloat16 if _bf16_elementwise_ok() else jnp.float32
    TB, B_pad = _pick_batch_tile(B, S)
    grid = (B_pad // TB,)

    # Wrapper-side layout plumbing (cheap XLA ops): pad only if needed, cast, transpose.
    xb = x.astype(jnp.bfloat16)
    if B_pad != B:
        xb = jnp.pad(xb, ((0, B_pad - B), (0, 0)))
    x_t = xb.T                                              # (S, B_pad)

    w1_t = w1.T.astype(jnp.bfloat16)                        # (256, S)
    w2_t = w2.T.astype(jnp.bfloat16)                        # (128, 256)
    w3_r = w3.astype(jnp.bfloat16)                          # (1, 128)  (out, in) row
    b1_c = b1.reshape(h1_dim, 1).astype(ew_dtype)           # (256, 1)
    b2_c = b2.reshape(h2_dim, 1).astype(ew_dtype)           # (128, 1)
    b3_s = b3.reshape(1, 1).astype(jnp.float32)             # scalar in SMEM

    flops = 2 * B_pad * (S * h1_dim + h1_dim * h2_dim + h2_dim)
    bytes_accessed = (x_t.size * 2 + w1_t.size * 2 + w2_t.size * 2 + w3_r.size * 2
                      + b1_c.size * b1_c.dtype.itemsize + b2_c.size * b2_c.dtype.itemsize
                      + 4 + B_pad * 4)

    out_t = pl.pallas_call(
        _value_net_kernel,
        out_shape=jax.ShapeDtypeStruct((1, B_pad), jnp.float32),
        grid=grid,
        in_specs=[
            pl.BlockSpec((S, TB), lambda i: (0, i)),              # x column tile
            pl.BlockSpec((h1_dim, S), lambda i: (0, 0)),          # w1^T: resident
            pl.BlockSpec((h1_dim, 1), lambda i: (0, 0)),          # b1:   resident
            pl.BlockSpec((h2_dim, h1_dim), lambda i: (0, 0)),     # w2^T: resident
            pl.BlockSpec((h2_dim, 1), lambda i: (0, 0)),          # b2:   resident
            pl.BlockSpec((1, h2_dim), lambda i: (0, 0)),          # w3 row: resident
            pl.BlockSpec(memory_space=pltpu.MemorySpace.SMEM),    # b3 scalar
        ],
        out_specs=pl.BlockSpec((1, TB), lambda i: (0, i)),        # lane-dense output
        compiler_params=pltpu.CompilerParams(
            dimension_semantics=("parallel",)),
        cost_estimate=pl.CostEstimate(flops=flops, transcendentals=0,
                                      bytes_accessed=bytes_accessed),
    )(x_t, w1_t, b1_c, w2_t, b2_c, w3_r, b3_s)

    # (1, B_pad) -> (B, 1): padded columns (garbage from the ReLU(b1) path) sliced off.
    return out_t[0, :B][:, None]


def init_value_network_params(key, state_dim):
    """Shapes: w1 (S,256), b1 (1,256), w2 (256,128), b2 (1,128),
    w3 (1,128) [PyTorch (out,in) row layout], b3 (1,1). All f32."""
    layer_dims = [(state_dim, 256), (256, 128), (128, 1)]
    params = []
    for idx, (fan_in, fan_out) in enumerate(layer_dims):
        kw, kb, key = jax.random.split(key, 3)
        bound = float(fan_in) ** -0.5
        w = jax.random.uniform(kw, (fan_in, fan_out), jnp.float32, -bound, bound)
        b = jax.random.uniform(kb, (1, fan_out), jnp.float32, -bound, bound)
        if idx == 2:
            w = w.T                          # final layer stored as (1, 128) row
        params.extend([w, b])
    return tuple(params)


def _reference_forward_f32(x, params):
    """Pure-JAX f32 reference (matches the PyTorch module semantics)."""
    w1, b1, w2, b2, w3, b3 = params
    if x.ndim == 1:
        x = x[None, :]
    h1 = jnp.maximum(x @ w1 + b1, 0.0)
    h2 = jnp.maximum(h1 @ w2 + b2, 0.0)
    return h2 @ w3.T + b3


def _reference_forward_kernel_precision(x, params):
    """Pure-JAX reference mirroring the kernel's bf16-at-the-dot precision path."""
    w1, b1, w2, b2, w3, b3 = params
    if x.ndim == 1:
        x = x[None, :]
    ew = jnp.bfloat16 if _bf16_elementwise_ok() else jnp.float32
    xb = x.astype(jnp.bfloat16)
    a1 = jnp.dot(xb, w1.astype(jnp.bfloat16), preferred_element_type=jnp.float32)
    h1 = jnp.maximum(a1.astype(ew) + b1.astype(ew), 0.0)
    a2 = jnp.dot(h1.astype(jnp.bfloat16), w2.astype(jnp.bfloat16),
                 preferred_element_type=jnp.float32)
    h2 = jnp.maximum(a2.astype(ew) + b2.astype(ew), 0.0)
    out = jnp.dot(h2.astype(jnp.bfloat16), w3.astype(jnp.bfloat16).T,
                  preferred_element_type=jnp.float32)
    return out + b3


if __name__ == "__main__":
    key = jax.random.PRNGKey(0)
    k_params, k_x = jax.random.split(key)

    state_dim = 32
    batch = 8

    params = init_value_network_params(k_params, state_dim)
    x = jax.random.normal(k_x, (batch, state_dim), jnp.float32)

    out = jax.block_until_ready(value_network_forward(x, params))
    assert out.shape == (batch, 1), out.shape

    ref_kp = _reference_forward_kernel_precision(x, params)
    ref_f32 = _reference_forward_f32(x, params)
    assert jnp.allclose(out, ref_kp, atol=5e-3, rtol=5e-3), "mismatch vs kernel-precision reference"
    assert jnp.allclose(out, ref_f32, atol=5e-2, rtol=5e-2), "mismatch vs f32 reference"

    # Also exercise the 1-D input path (torch unsqueeze(0) behavior).
    out1 = jax.block_until_ready(value_network_forward(x[0], params))
    assert out1.shape == (1, 1)
    assert jnp.allclose(out1, ref_kp[0:1], atol=5e-3, rtol=5e-3)

    # Exercise a larger, multi-tile batch (grid >= 2, unaligned -> padded path).
    k_big = jax.random.PRNGKey(1)
    x_big = jax.random.normal(k_big, (300, state_dim), jnp.float32)
    out_big = jax.block_until_ready(value_network_forward(x_big, params))
    assert out_big.shape == (300, 1)
    assert jnp.allclose(out_big, _reference_forward_kernel_precision(x_big, params),
                        atol=5e-3, rtol=5e-3), "mismatch on multi-tile batch"

    print("KERNEL_OK")
</pallas_src>

<mosaic_0001>
module attributes {stable_mosaic.version = 11 : i64} {
  func.func @_value_net_kernel(%arg0: i32, %arg1: memref<32x128xbf16, #tpu.memory_space<vmem>>, %arg2: memref<256x32xbf16, #tpu.memory_space<vmem>>, %arg3: memref<256x1xf32, #tpu.memory_space<vmem>>, %arg4: memref<128x256xbf16, #tpu.memory_space<vmem>>, %arg5: memref<128x1xf32, #tpu.memory_space<vmem>>, %arg6: memref<1x128xbf16, #tpu.memory_space<vmem>>, %arg7: memref<1x1xf32, #tpu.memory_space<smem>>, %arg8: memref<1x128xf32, #tpu.memory_space<vmem>>) attributes {dimension_semantics = [#tpu.dimension_semantics<parallel>], iteration_bounds = array<i64: 1>, scalar_prefetch = 0 : i64, scratch_operands = 0 : i64, tpu.core_type = #tpu.core_type<tc>, window_params = [{transform_indices = @transform_0, window_bounds = array<i64: 32, 128>}, {pipeline_mode = #tpu.pipeline_mode<synchronous>, transform_indices = @transform_1, window_bounds = array<i64: 256, 32>}, {pipeline_mode = #tpu.pipeline_mode<synchronous>, transform_indices = @transform_2, window_bounds = array<i64: 256, 1>}, {pipeline_mode = #tpu.pipeline_mode<synchronous>, transform_indices = @transform_3, window_bounds = array<i64: 128, 256>}, {pipeline_mode = #tpu.pipeline_mode<synchronous>, transform_indices = @transform_4, window_bounds = array<i64: 128, 1>}, {pipeline_mode = #tpu.pipeline_mode<synchronous>, transform_indices = @transform_5, window_bounds = array<i64: 1, 128>}, {transform_indices = @transform_6, window_bounds = array<i64: 1, 1>}, {transform_indices = @transform_7, window_bounds = array<i64: 1, 128>}]} {
    %c0 = arith.constant 0 : index
    %c0_0 = arith.constant 0 : index
    %0 = vector.load %arg1[%c0, %c0_0] : memref<32x128xbf16, #tpu.memory_space<vmem>>, vector<32x128xbf16>
    %c0_1 = arith.constant 0 : index
    %c0_2 = arith.constant 0 : index
    %1 = vector.load %arg2[%c0_1, %c0_2] : memref<256x32xbf16, #tpu.memory_space<vmem>>, vector<256x32xbf16>
    %cst = arith.constant dense<0.000000e+00> : vector<256x128xf32>
    %2 = tpu.matmul %1, %0, %cst {dimension_numbers = #tpu.dot_dimension_numbers<[1], [0], [0], [1], [0, 0, 1, 1], [], []>} : vector<256x32xbf16>, vector<32x128xbf16>, vector<256x128xf32> -> vector<256x128xf32>
    %c0_3 = arith.constant 0 : index
    %c0_4 = arith.constant 0 : index
    %3 = vector.load %arg3[%c0_3, %c0_4] : memref<256x1xf32, #tpu.memory_space<vmem>>, vector<256x1xf32>
    %4 = vector.broadcast %3 : vector<256x1xf32> to vector<256x128xf32>
    %5 = arith.addf %2, %4 : vector<256x128xf32>
    %cst_5 = arith.constant 0.000000e+00 : f32
    %6 = vector.broadcast %cst_5 : f32 to vector<256x128xf32>
    %7 = arith.maximumf %5, %6 : vector<256x128xf32>
    %c0_6 = arith.constant 0 : index
    %c0_7 = arith.constant 0 : index
    %8 = vector.load %arg4[%c0_6, %c0_7] : memref<128x256xbf16, #tpu.memory_space<vmem>>, vector<128x256xbf16>
    %9 = arith.truncf %7 : vector<256x128xf32> to vector<256x128xbf16>
    %cst_8 = arith.constant dense<0.000000e+00> : vector<128x128xf32>
    %10 = tpu.matmul %8, %9, %cst_8 {dimension_numbers = #tpu.dot_dimension_numbers<[1], [0], [0], [1], [0, 0, 1, 1], [], []>} : vector<128x256xbf16>, vector<256x128xbf16>, vector<128x128xf32> -> vector<128x128xf32>
    %c0_9 = arith.constant 0 : index
    %c0_10 = arith.constant 0 : index
    %11 = vector.load %arg5[%c0_9, %c0_10] : memref<128x1xf32, #tpu.memory_space<vmem>>, vector<128x1xf32>
    %12 = vector.broadcast %11 : vector<128x1xf32> to vector<128x128xf32>
    %13 = arith.addf %10, %12 : vector<128x128xf32>
    %cst_11 = arith.constant 0.000000e+00 : f32
    %14 = vector.broadcast %cst_11 : f32 to vector<128x128xf32>
    %15 = arith.maximumf %13, %14 : vector<128x128xf32>
    %c0_12 = arith.constant 0 : index
    %c0_13 = arith.constant 0 : index
    %16 = vector.load %arg6[%c0_12, %c0_13] : memref<1x128xbf16, #tpu.memory_space<vmem>>, vector<1x128xbf16>
    %17 = arith.truncf %15 : vector<128x128xf32> to vector<128x128xbf16>
    %cst_14 = arith.constant dense<0.000000e+00> : vector<1x128xf32>
    %18 = tpu.matmul %16, %17, %cst_14 {dimension_numbers = #tpu.dot_dimension_numbers<[1], [0], [0], [1], [0, 0, 1, 1], [], []>} : vector<1x128xbf16>, vector<128x128xbf16>, vector<1x128xf32> -> vector<1x128xf32>
    %c0_15 = arith.constant 0 : index
    %c0_16 = arith.constant 0 : index
    %19 = memref.load %arg7[%c0_15, %c0_16] : memref<1x1xf32, #tpu.memory_space<smem>>
    %20 = vector.broadcast %19 : f32 to vector<1x128xf32>
    %21 = arith.addf %18, %20 : vector<1x128xf32>
    %c0_17 = arith.constant 0 : index
    %c0_18 = arith.constant 0 : index
    %22 = vector.load %arg8[%c0_17, %c0_18] : memref<1x128xf32, #tpu.memory_space<vmem>>, vector<1x128xf32>
    tpu.vector_store %arg8[%c0_17, %c0_18], %21 {strides = array<i32>} : memref<1x128xf32, #tpu.memory_space<vmem>>, vector<1x128xf32>,
    return
  }
  func.func @transform_0(%arg0: i32) -> (i32, i32) {
    %c0_i32 = arith.constant 0 : i32
    %c0_i32_0 = arith.constant 0 : i32
    return %c0_i32, %arg0 : i32, i32
  }
  func.func @transform_1(%arg0: i32) -> (i32, i32) {
    %c0_i32 = arith.constant 0 : i32
    %c0_i32_0 = arith.constant 0 : i32
    %c0_i32_1 = arith.constant 0 : i32
    return %c0_i32, %c0_i32_0 : i32, i32
  }
  func.func @transform_2(%arg0: i32) -> (i32, i32) {
    %c0_i32 = arith.constant 0 : i32
    %c0_i32_0 = arith.constant 0 : i32
    %c0_i32_1 = arith.constant 0 : i32
    return %c0_i32, %c0_i32_0 : i32, i32
  }
  func.func @transform_3(%arg0: i32) -> (i32, i32) {
    %c0_i32 = arith.constant 0 : i32
    %c0_i32_0 = arith.constant 0 : i32
    %c0_i32_1 = arith.constant 0 : i32
    return %c0_i32, %c0_i32_0 : i32, i32
  }
  func.func @transform_4(%arg0: i32) -> (i32, i32) {
    %c0_i32 = arith.constant 0 : i32
    %c0_i32_0 = arith.constant 0 : i32
    %c0_i32_1 = arith.constant 0 : i32
    return %c0_i32, %c0_i32_0 : i32, i32
  }
  func.func @transform_5(%arg0: i32) -> (i32, i32) {
    %c0_i32 = arith.constant 0 : i32
    %c0_i32_0 = arith.constant 0 : i32
    %c0_i32_1 = arith.constant 0 : i32
    return %c0_i32, %c0_i32_0 : i32, i32
  }
  func.func @transform_6(%arg0: i32) -> (i32, i32) {
    %c0_i32 = arith.constant 0 : i32
    %c0_i32_0 = arith.constant 0 : i32
    %c0_i32_1 = arith.constant 0 : i32
    return %c0_i32, %c0_i32_0 : i32, i32
  }
  func.func @transform_7(%arg0: i32) -> (i32, i32) {
    %c0_i32 = arith.constant 0 : i32
    %c0_i32_0 = arith.constant 0 : i32
    return %c0_i32, %arg0 : i32, i32
  }
}

</mosaic_0001>

<bundles_post_ra>
// kernel: tpu_custom_call.1
= control target key start
LH: loop header
LB: loop body
LE: loop exit
PB: predicated region body
PF: predicated region fallthrough
CT: control target
= control target key end

     0   :  { %v1247_v1 = vmov 0   ;;  %vm349_vm0 = vcmask 261120   ;;  %s1652_s0 = inlined_call_operand.vmem [shape: bf16[32,128], index: 0, kind: input, shape index: {}]   ;;  %s1653_s1 = inlined_call_operand.vmem [shape: bf16[256,32], index: 1, kind: input, shape index: {}]   ;;  %s1654_s2 = inlined_call_operand.vmem [shape: f32[256,1], index: 2, kind: input, shape index: {}]   ;;  %s1655_s3 = inlined_call_operand.vmem [shape: bf16[128,256], index: 3, kind: input, shape index: {}]   ;;  %s1656_s4 = inlined_call_operand.vmem [shape: f32[128,1], index: 4, kind: input, shape index: {}]   ;;  %s1657_s5 = inlined_call_operand.vmem [shape: bf16[1,128], index: 5, kind: input, shape index: {}]   ;;  %s1658_s6 = inlined_call_operand.<no memory space> [shape: f32[1,1], index: 6, kind: input, shape index: {}]   ;;  %s1659_s7 = inlined_call_operand.hbm [shape: f32[1,128], index: 7, kind: output, shape index: {}]  }
   0x1   :  { %v1181_v0 = vld [vmem:[%s1652_s0] sm:$0xff]   ;;  %1180 = vset.pattern.permute.xlu1 %v1247_v1  ;;  %1179 = vset.pattern.permute.xlu0 %v1247_v1  ;;  %v1182_v4 = vld [vmem:[%s1652_s0 + $0x8] sm:$0xff]   ;;  %v83_v9 = vld [vmem:[%s1654_s2 + $0x90] sm:$0xff] }
   0x2   :  { %v81_v2 = vld [vmem:[%s1654_s2 + $0x80] sm:$0xff]  ;;  %1119 = vmatprep.subr.bf16.mxu0 %v1181_v0  ;;  %v82_v6 = vld [vmem:[%s1654_s2 + $0x88] sm:$0xff]  ;;  %v1185_v10 = vld [vmem:[%s1653_s1 + $0x10] sm:$0xff]  }
   0x3   :  { %v65_v3 = vld [vmem:[%s1654_s2] sm:$0xff]  ;;  %179 = vperm.xlu0 %1179, %v81_v2   ;;  %1120 = vmatpush3.bf16.msra.mxu0 %v1181_v0  ;;  %v66_v7 = vld [vmem:[%s1654_s2 + $0x8] sm:$0xff]  ;;  %v84_v11 = vld [vmem:[%s1654_s2 + $0x98] sm:$0xff] }
   0x4   :  { %99 = vperm.xlu1 %1180, %v65_v3   ;;  %v1183_v5 = vld [vmem:[%s1653_s1] sm:$0xff]   ;;  %1121 = vmatprep.subr.bf16.mxu0 %v1182_v4  ;;  %v1184_v8 = vld [vmem:[%s1653_s1 + $0x8] sm:$0xff]   ;;  %v67_v12 = vld [vmem:[%s1654_s2 + $0x10] sm:$0xff] }
   0x5   :  { %1123 = vmatprep.mubr.msk.bf16.mxu0 %vm349_vm0, %v1183_v5  ;;  %v68_v13 = vld [vmem:[%s1654_s2 + $0x18] sm:$0xff]  ;;  %v85_v15 = vld [vmem:[%s1654_s2 + $0xa0] sm:$0xff]  ;;  %v86_v17 = vld [vmem:[%s1654_s2 + $0xa8] sm:$0xff] }
   0x6   :  { %v1186_v14 = vld [vmem:[%s1653_s1 + $0x18] sm:$0xff]   ;;  %v1187_v16 = vld [vmem:[%s1653_s1 + $0x20] sm:$0xff]   ;;  %v70_v19 = vld [vmem:[%s1654_s2 + $0x28] sm:$0xff] }
   0x7   :  { %184 = vperm.xlu0 %1179, %v82_v6   ;;  %1122 = vmatpush3.bf16.msra.mxu0 %v1182_v4  ;;  %v69_v18 = vld [vmem:[%s1654_s2 + $0x20] sm:$0xff]  ;;  %v1188_v20 = vld [vmem:[%s1653_s1 + $0x28] sm:$0xff]   ;;  %v87_v21 = vld [vmem:[%s1654_s2 + $0xb0] sm:$0xff] }
   0x8   :  { %104 = vperm.xlu1 %1180, %v66_v7   ;;  %v1189_v22 = vld [vmem:[%s1653_s1 + $0x30] sm:$0xff]   ;;  %v88_v23 = vld [vmem:[%s1654_s2 + $0xb8] sm:$0xff]  ;;  %v89_v27 = vld [vmem:[%s1654_s2 + $0xc0] sm:$0xff] }
   0x9   :  { %v71_v24 = vld [vmem:[%s1654_s2 + $0x30] sm:$0xff]  ;;  %v72_v25 = vld [vmem:[%s1654_s2 + $0x38] sm:$0xff]  ;;  %v1191_v28 = vld [vmem:[%s1653_s1 + $0x40] sm:$0xff]  }
   0xa   :  { %1124 = vmatmul.mubr.msk.bf16.vlgmr.msra.gmra.mrb[0].mxu0 %vm349_vm0, %v1184_v8  ;;  %v1190_v26 = vld [vmem:[%s1653_s1 + $0x38] sm:$0xff]   ;;  %v90_v29 = vld [vmem:[%s1654_s2 + $0xc8] sm:$0xff]  ;;  %v73_v30 = vld [vmem:[%s1654_s2 + $0x40] sm:$0xff] }
   0xb   :  { %189 = vperm.xlu0 %1179, %v83_v9   ;;  %1127 = vmatprep.mubr.msk.bf16.mxu0 %vm349_vm0, %v1185_v10  ;;  %v74_v31 = vld [vmem:[%s1654_s2 + $0x48] sm:$0xff]  ;;  %v91_v33 = vld [vmem:[%s1654_s2 + $0xd0] sm:$0xff] }
   0xc   :  { %194 = vperm.xlu1 %1180, %v84_v11   ;;  %v1192_v32 = vld [vmem:[%s1653_s1 + $0x48] sm:$0xff]   ;;  %v1193_v34 = vld [vmem:[%s1653_s1 + $0x50] sm:$0xff]  }
   0xf   :  { %109 = vperm.xlu0 %1179, %v67_v12  }
  0x10   :  { %114 = vperm.xlu1 %1180, %v68_v13  }
  0x12   :  { %1128 = vmatmul.mubr.msk.bf16.gmra.mrb[4].mxu0 %vm349_vm0, %v1186_v14 }
  0x13   :  { %199 = vperm.xlu0 %1179, %v85_v15   ;;  %1131 = vmatprep.mubr.msk.bf16.mxu0 %vm349_vm0, %v1187_v16 }
  0x14   :  { %204 = vperm.xlu1 %1180, %v86_v17  }
  0x17   :  { %119 = vperm.xlu0 %1179, %v69_v18  }
  0x18   :  { %124 = vperm.xlu1 %1180, %v70_v19  }
  0x1a   :  { %1132 = vmatmul.mubr.msk.bf16.gmra.mrb[8].mxu0 %vm349_vm0, %v1188_v20 }
  0x1b   :  { %209 = vperm.xlu0 %1179, %v87_v21   ;;  %1135 = vmatprep.mubr.msk.bf16.mxu0 %vm349_vm0, %v1189_v22 }
  0x1c   :  { %214 = vperm.xlu1 %1180, %v88_v23  }
  0x1f   :  { %129 = vperm.xlu0 %1179, %v71_v24  }
  0x20   :  { %134 = vperm.xlu1 %1180, %v72_v25  }
  0x22   :  { %1136 = vmatmul.mubr.msk.bf16.gmra.mrb[12].mxu0 %vm349_vm0, %v1190_v26 }
  0x23   :  { %219 = vperm.xlu0 %1179, %v89_v27   ;;  %1139 = vmatprep.mubr.msk.bf16.mxu0 %vm349_vm0, %v1191_v28 }
  0x24   :  { %224 = vperm.xlu1 %1180, %v90_v29  }
  0x27   :  { %139 = vperm.xlu0 %1179, %v73_v30  }
  0x28   :  { %144 = vperm.xlu1 %1180, %v74_v31  }
  0x29   :  { %13 = vsyncpa [#allocation4], 0  ;;  %v92_v35 = vld [vmem:[%s1654_s2 + $0xd8] sm:$0xff]  ;;  %v75_v36 = vld [vmem:[%s1654_s2 + $0x50] sm:$0xff]  ;;  %vm1249_vm1 = vmmov 0   ;;  %s1250_s15 = smov [#allocation3]  }
  0x2a   :  { %1140 = vmatmul.mubr.msk.bf16.gmra.mrb[16].mxu0 %vm349_vm0, %v1192_v32  ;;  %v76_v37 = vld [vmem:[%s1654_s2 + $0x58] sm:$0xff]  ;;  %v93_v39 = vld [vmem:[%s1654_s2 + $0xe0] sm:$0xff]  ;;  %v94_v41 = vld [vmem:[%s1654_s2 + $0xe8] sm:$0xff]  ;;  %s970_s16 = sshll.u32 %s1250_s15, 4  ;;  %s971_s16 = int_to_ptr.vmem [resolvable:$true] %s970_s16 }
  0x2b   :  { %229 = vperm.xlu0 %1179, %v91_v33   ;;  %1143 = vmatprep.mubr.msk.bf16.mxu0 %vm349_vm0, %v1193_v34  ;;  %v1194_v38 = vld [vmem:[%s1653_s1 + $0x58] sm:$0xff]   ;;  %v1195_v40 = vld [vmem:[%s1653_s1 + $0x60] sm:$0xff]   ;;  %v78_v43 = vld [vmem:[%s1654_s2 + $0x68] sm:$0xff]  ;;  %s1223_s17 = scalar_lea.vmem %s971_s16, 16  ;;  %s1227_s18 = scalar_lea.vmem %s971_s16, 32 }
  0x2c   :  { %234 = vperm.xlu1 %1180, %v92_v35   ;;  %v77_v42 = vld [vmem:[%s1654_s2 + $0x60] sm:$0xff]  ;;  %v1196_v44 = vld [vmem:[%s1653_s1 + $0x68] sm:$0xff]   ;;  %v95_v45 = vld [vmem:[%s1654_s2 + $0xf0] sm:$0xff]  ;;  %p1224_p0 = scmp.ne.s32.totalorder %s971_s16, %s1223_s17  ;;  %p1228_p1 = scmp.lt.s32.totalorder %s971_s16, %s971_s16 }
  0x2d   :  { %v1197_v46 = vld [vmem:[%s1653_s1 + $0x70] sm:$0xff]   ;;  %v96_v47 = vld [vmem:[%s1654_s2 + $0xf8] sm:$0xff]  ;;  %v623_v51 = vld [vmem:[%s1656_s4] sm:$0xff]  ;;  %p1229_p2 = scmp.lt.s32.totalorder %s1227_s18, %s1223_s17 }
  0x2e   :  { %v79_v48 = vld [vmem:[%s1654_s2 + $0x70] sm:$0xff]  ;;  %v80_v49 = vld [vmem:[%s1654_s2 + $0x78] sm:$0xff]  ;;  %v624_v52 = vld [vmem:[%s1656_s4 + $0x8] sm:$0xff] }
  0x2f   :  { %149 = vperm.xlu0 %1179, %v75_v36   ;;  %v1198_v50 = vld [vmem:[%s1653_s1 + $0x78] sm:$0xff]   ;;  %v625_v53 = vld [vmem:[%s1656_s4 + $0x10] sm:$0xff]  ;;  %v627_v55 = vld [vmem:[%s1656_s4 + $0x20] sm:$0xff]  ;;  %p1230_p3 = por %p1229_p2, %p1228_p1 }
  0x30   :  { %154 = vperm.xlu1 %1180, %v76_v37   ;;  %v626_v54 = vld [vmem:[%s1656_s4 + $0x18] sm:$0xff]  ;;  %v628_v56 = vld [vmem:[%s1656_s4 + $0x28] sm:$0xff]  ;;  %v629_v57 = vld [vmem:[%s1656_s4 + $0x30] sm:$0xff] }
  0x31   :  { %v630_v58 = vld [vmem:[%s1656_s4 + $0x38] sm:$0xff]  ;;  %v631_v59 = vld [vmem:[%s1656_s4 + $0x40] sm:$0xff]  ;;  %v632_v60 = vld [vmem:[%s1656_s4 + $0x48] sm:$0xff]  ;;  %p1231_p4 = pnand %p1230_p3, %p1224_p0 }
  0x32   :  { %1144 = vmatmul.mubr.msk.bf16.gmra.mrb[20].mxu0 %vm349_vm0, %v1194_v38  ;;  %v633_v61 = vld [vmem:[%s1656_s4 + $0x50] sm:$0xff]  ;;  %v634_v62 = vld [vmem:[%s1656_s4 + $0x58] sm:$0xff]  ;;  %v635_v63 = vld [vmem:[%s1656_s4 + $0x60] sm:$0xff] }
  0x33   :  { %239 = vperm.xlu0 %1179, %v93_v39   ;;  %1147 = vmatprep.mubr.msk.bf16.mxu0 %vm349_vm0, %v1195_v40  ;;  %v636_v0 = vld [vmem:[%s1656_s4 + $0x68] sm:$0xff]  ;;  %v637_v1 = vld [vmem:[%s1656_s4 + $0x70] sm:$0xff]  ;;  %v638_v2 = vld [vmem:[%s1656_s4 + $0x78] sm:$0xff] }
  0x34   :  { %244 = vperm.xlu1 %1180, %v94_v41   ;;  %v1201_v7 = vld [vmem:[%s1655_s3 + $0x4] ss:$8 sps:$4 sm:$0xff]  }
  0x35   :  { %831 = vmatprep.mubr.bf16.mxu1 %v1201_v7 }
  0x37   :  { %159 = vperm.xlu0 %1179, %v77_v42  }
  0x38   :  { %164 = vperm.xlu1 %1180, %v78_v43  }
  0x3a   :  { %1148 = vmatmul.mubr.msk.bf16.gmra.mrb[24].mxu0 %vm349_vm0, %v1196_v44 }
  0x3b   :  { %249 = vperm.xlu0 %1179, %v95_v45   ;;  %1151 = vmatprep.mubr.msk.bf16.mxu0 %vm349_vm0, %v1197_v46 }
  0x3c   :  { %254 = vperm.xlu1 %1180, %v96_v47  }
  0x3f   :  { %169 = vperm.xlu0 %1179, %v79_v48  }
  0x40   :  { %174 = vperm.xlu1 %1180, %v80_v49  }
  0x42   :  { %1152 = vmatmul.mubr.msk.bf16.gmra.mrb[28].mxu0 %vm349_vm0, %v1198_v50 }
  0x43   :  { %641 = vperm.xlu0 %1179, %v623_v51  }
  0x44   :  { %646 = vperm.xlu1 %1180, %v624_v52  }
  0x47   :  { %651 = vperm.xlu0 %1179, %v625_v53  }
  0x48   :  { %656 = vperm.xlu1 %1180, %v626_v54  }
  0x4b   :  { %661 = vperm.xlu0 %1179, %v627_v55  }
  0x4c   :  { %666 = vperm.xlu1 %1180, %v628_v56  }
  0x4f   :  { %671 = vperm.xlu0 %1179, %v629_v57  }
  0x50   :  { %676 = vperm.xlu1 %1180, %v630_v58  }
  0x53   :  { %681 = vperm.xlu0 %1179, %v631_v59  }
  0x54   :  { %686 = vperm.xlu1 %1180, %v632_v60  }
  0x57   :  { %691 = vperm.xlu0 %1179, %v633_v61  }
  0x58   :  { %696 = vperm.xlu1 %1180, %v634_v62  }
  0x5b   :  { %701 = vperm.xlu0 %1179, %v635_v63  }
  0x5c   :  { %706 = vperm.xlu1 %1180, %v636_v0  }
  0x5f   :  { %711 = vperm.xlu0 %1179, %v637_v1  }
  0x60   :  { %716 = vperm.xlu1 %1180, %v638_v2  }
  0x82   :  { %v1505_v3 = vpop.permute.xlu0 %179 }
  0x83   :  { %v100_v4 = vpop.permute.xlu1 %99 }
  0x86   :  { %v1507_v5 = vpop.permute.xlu0 %184 }
  0x87   :  { %v105_v6 = vpop.permute.xlu1 %104 }
  0x8a   :  { %v1512_v8 = vpop.permute.xlu0 %189 }
  0x8b   :  { %v1514_v9 = vpop.permute.xlu1 %194 }
  0x8e   :  { %v110_v10 = vpop.permute.xlu0 %109 }
  0x8f   :  { %v115_v11 = vpop.permute.xlu1 %114 }
  0x92   :  { %v1516_v12 = vpop.permute.xlu0 %199 }
  0x93   :  { %v1518_v13 = vpop.permute.xlu1 %204 }
  0x96   :  { %v120_v14 = vpop.permute.xlu0 %119 }
  0x97   :  { %v125_v15 = vpop.permute.xlu1 %124 }
  0x9a   :  { %v1520_v16 = vpop.permute.xlu0 %209 }
  0x9b   :  { %v1522_v17 = vpop.permute.xlu1 %214 }
  0x9e   :  { %v130_v18 = vpop.permute.xlu0 %129 }
  0x9f   :  { %v135_v19 = vpop.permute.xlu1 %134 }
  0xa2   :  { %v1524_v20 = vpop.permute.xlu0 %219 }
  0xa3   :  { %v1526_v21 = vpop.permute.xlu1 %224 }
  0xa6   :  { %v140_v22 = vpop.permute.xlu0 %139 }
  0xa7   :  { %v145_v23 = vpop.permute.xlu1 %144 }
  0xaa   :  { %v1528_v24 = vpop.permute.xlu0 %229 }
  0xab   :  { %v1530_v25 = vpop.permute.xlu1 %234 }
  0xae   :  { %v150_v26 = vpop.permute.xlu0 %149 }
  0xaf   :  { %v155_v30 = vpop.permute.xlu1 %154 }
  0xb2   :  { %v1532_v38 = vpop.permute.xlu0 %239 }
  0xb3   :  { %v1536_v42 = vpop.permute.xlu1 %244 }
  0xb6   :  { %v160_v51 = vpop.permute.xlu0 %159 }
  0xb7   :  { %v165_v55 = vpop.permute.xlu1 %164 }
  0xba   :  { %v1544_v63 = vpop.permute.xlu0 %249 }
  0xdd   :  { %v1125_v27 = vpop.f32.mrb[0].mxu0 }
  0xde   :  { %v441_v28 = vadd.f32 %v1125_v27, %v110_v10  ;;  %v432_v29 = vpop.f32.mrb[1].mxu0 }
  0xdf   :  { %v433_v31 = vadd.f32 %v432_v29, %v100_v4  ;;  %v1126_v32 = vpop.f32.mrb[2].mxu0 }
  0xe0   :  { %v444_v33 = vadd.f32 %v1126_v32, %v115_v11  ;;  %v435_v34 = vpop.f32.mrb[3].mxu0  ;;  %v561_v36 = vmax.f32 %v441_v28, 0.0 }
  0xe1   :  { %v436_v35 = vadd.f32 %v435_v34, %v105_v6  ;;  %v559_v39 = vmax.f32 %v433_v31, 0.0  ;;  %v1546_v6 = vpop.permute.xlu1 %254 }
  0xe2   :  { %v562_v37 = vmax.f32 %v444_v33, 0.0 }
  0xe3   :  { %v560_v40 = vmax.f32 %v436_v35, 0.0 }
  0xe4   :  { %v1534_v41 = vpack.c.bf16 %v562_v37, %v561_v36 }
  0xe5   :  { %v1129_v43 = vpop.f32.mrb[4].mxu0  ;;  %v1538_v44 = vpack.c.bf16 %v560_v40, %v559_v39  ;;  %v175_v31 = vpop.permute.xlu1 %174 }
  0xe6   :  { %v457_v45 = vadd.f32 %v1129_v43, %v130_v18  ;;  %v448_v46 = vpop.f32.mrb[5].mxu0 }
  0xe7   :  { %v449_v47 = vadd.f32 %v448_v46, %v120_v14  ;;  %v1130_v48 = vpop.f32.mrb[6].mxu0 }
  0xe8   :  { %v460_v49 = vadd.f32 %v1130_v48, %v135_v19  ;;  %v451_v50 = vpop.f32.mrb[7].mxu0  ;;  %v565_v53 = vmax.f32 %v457_v45, 0.0  ;;  %v170_v19 = vpop.permute.xlu0 %169 }
  0xe9   :  { %v452_v52 = vadd.f32 %v451_v50, %v125_v15  ;;  %v563_v56 = vmax.f32 %v449_v47, 0.0 }
  0xea   :  { %v566_v54 = vmax.f32 %v460_v49, 0.0 }
  0xeb   :  { %v564_v57 = vmax.f32 %v452_v52, 0.0 }
  0xec   :  { %v1540_v58 = vpack.c.bf16 %v566_v54, %v565_v53 }
  0xed   :  { %v1542_v59 = vpack.c.bf16 %v564_v57, %v563_v56  ;;  %v1133_v60 = vpop.f32.mrb[8].mxu0 }
  0xee   :  { %v473_v61 = vadd.f32 %v1133_v60, %v150_v26  ;;  %v464_v62 = vpop.f32.mrb[9].mxu0 }
  0xef   :  { %v465_v0 = vadd.f32 %v464_v62, %v140_v22  ;;  %v1134_v1 = vpop.f32.mrb[10].mxu0 }
  0xf0   :  { %v476_v2 = vadd.f32 %v1134_v1, %v155_v30  ;;  %v467_v4 = vpop.f32.mrb[11].mxu0  ;;  %v569_v10 = vmax.f32 %v473_v61, 0.0 }
  0xf1   :  { %v468_v7 = vadd.f32 %v467_v4, %v145_v23  ;;  %v567_v14 = vmax.f32 %v465_v0, 0.0 }
  0xf2   :  { %v570_v11 = vmax.f32 %v476_v2, 0.0 }
  0xf3   :  { %v568_v15 = vmax.f32 %v468_v7, 0.0 }
  0xf4   :  { %v1548_v18 = vpack.c.bf16 %v570_v11, %v569_v10 }
  0xf5   :  { %v1550_v27 = vpack.c.bf16 %v568_v15, %v567_v14  ;;  %v1137_v26 = vpop.f32.mrb[12].mxu0 }
  0xf6   :  { %v489_v28 = vadd.f32 %v1137_v26, %v170_v19  ;;  %v480_v29 = vpop.f32.mrb[13].mxu0 }
  0xf7   :  { %v481_v22 = vadd.f32 %v480_v29, %v160_v51  ;;  %v1138_v32 = vpop.f32.mrb[14].mxu0 }
  0xf8   :  { %v492_v30 = vadd.f32 %v1138_v32, %v175_v31  ;;  %v483_v33 = vpop.f32.mrb[15].mxu0  ;;  %v573_v35 = vmax.f32 %v489_v28, 0.0 }
  0xf9   :  { %v484_v34 = vadd.f32 %v483_v33, %v165_v55  ;;  %v571_v36 = vmax.f32 %v481_v22, 0.0 }
  0xfa   :  { %v574_v23 = vmax.f32 %v492_v30, 0.0 }
  0xfb   :  { %v572_v37 = vmax.f32 %v484_v34, 0.0 }
  0xfc   :  { %v1552_v39 = vpack.c.bf16 %v574_v23, %v573_v35 }
  0xfd   :  { %v1554_v40 = vpack.c.bf16 %v572_v37, %v571_v36  ;;  %v1141_v43 = vpop.f32.mrb[16].mxu0  ;;  %v1208_v37 = vld [vmem:[%s1655_s3 + $0x34] ss:$8 sps:$4 sm:$0xff]  }
  0xfe   :  { %v505_v45 = vadd.f32 %v1141_v43, %v1512_v8  ;;  %v496_v46 = vpop.f32.mrb[17].mxu0  ;;  %v1213_v43 = vld [vmem:[%s1655_s3 + $0x40] ss:$8 sps:$4 sm:$0xff]  }
  0xff   :  { %v497_v47 = vadd.f32 %v496_v46, %v1505_v3  ;;  %v1142_v48 = vpop.f32.mrb[18].mxu0  ;;  %v1216_v46 = vld [vmem:[%s1655_s3 + $0x50] ss:$8 sps:$4 sm:$0xff]  }
 0x100   :  { %v508_v49 = vadd.f32 %v1142_v48, %v1514_v9  ;;  %v499_v50 = vpop.f32.mrb[19].mxu0  ;;  %v577_v52 = vmax.f32 %v505_v45, 0.0  ;;  %v1214_v45 = vld [vmem:[%s1655_s3 + $0x54] ss:$8 sps:$4 sm:$0xff]   ;;  %v1219_v48 = vld [vmem:[%s1655_s3 + $0x60] ss:$8 sps:$4 sm:$0xff]  }
 0x101   :  { %v500_v51 = vadd.f32 %v499_v50, %v1507_v5  ;;  %v575_v54 = vmax.f32 %v497_v47, 0.0  ;;  %v1217_v47 = vld [vmem:[%s1655_s3 + $0x64] ss:$8 sps:$4 sm:$0xff]   ;;  %v1222_v50 = vld [vmem:[%s1655_s3 + $0x70] ss:$8 sps:$4 sm:$0xff]  }
 0x102   :  { %v578_v53 = vmax.f32 %v508_v49, 0.0  ;;  %v1220_v49 = vld [vmem:[%s1655_s3 + $0x74] ss:$8 sps:$4 sm:$0xff]  }
 0x103   :  { %v576_v55 = vmax.f32 %v500_v51, 0.0  ;;  %v1248_v51 = vmov 0.0  }
 0x104   :  { %v616_v56 = vpack.c.bf16 %v578_v53, %v577_v52  ;;  %1155 = vmatprep.subr.bf16.mxu0 %v1248_v51  ;;  %1171 = vmatprep.mubr.msk.bf16.mxu0 %vm1249_vm1, %v1248_v51 }
 0x105   :  { %v1145_v57 = vpop.f32.mrb[20].mxu0  ;;  %v615_v60 = vpack.c.bf16 %v576_v55, %v575_v54 }
 0x106   :  { %v521_v61 = vadd.f32 %v1145_v57, %v1520_v16  ;;  %v512_v62 = vpop.f32.mrb[21].mxu0 }
 0x107   :  { %v513_v8 = vadd.f32 %v512_v62, %v1516_v12  ;;  %v1146_v0 = vpop.f32.mrb[22].mxu0  ;;  %1046 = vmatprep.subr.bf16.mxu1 %v615_v60  ;;  %v647_v62 = vpop.permute.xlu1 %646 }
 0x108   :  { %v524_v3 = vadd.f32 %v1146_v0, %v1522_v17  ;;  %v515_v9 = vpop.f32.mrb[23].mxu0  ;;  %1047 = vmatpush3.bf16.msra.mxu1 %v1538_v44  ;;  %v581_v1 = vmax.f32 %v521_v61, 0.0 }
 0x109   :  { %v516_v5 = vadd.f32 %v515_v9, %v1518_v13  ;;  %1048 = vmatprep.subr.bf16.mxu1 %v616_v56  ;;  %v579_v4 = vmax.f32 %v513_v8, 0.0  ;;  %v642_v56 = vpop.permute.xlu0 %641 }
 0x10a   :  { %v582_v2 = vmax.f32 %v524_v3, 0.0 }
 0x10b   :  { %v580_v7 = vmax.f32 %v516_v5, 0.0 }
 0x10c   :  { %v618_v10 = vpack.c.bf16 %v582_v2, %v581_v1  ;;  %1049 = vmatpush3.bf16.msra.mxu1 %v1534_v41 }
 0x10d   :  { %v617_v16 = vpack.c.bf16 %v580_v7, %v579_v4  ;;  %v1149_v11 = vpop.f32.mrb[24].mxu0  ;;  %v652_v7 = vpop.permute.xlu0 %651 }
 0x10e   :  { %v537_v12 = vadd.f32 %v1149_v11, %v1528_v24  ;;  %v528_v14 = vpop.f32.mrb[25].mxu0 }
 0x10f   :  { %v529_v17 = vadd.f32 %v528_v14, %v1524_v20  ;;  %v1150_v15 = vpop.f32.mrb[26].mxu0  ;;  %1050 = vmatprep.subr.bf16.mxu1 %v617_v16 }
 0x110   :  { %v540_v44 = vadd.f32 %v1150_v15, %v1530_v25  ;;  %v531_v13 = vpop.f32.mrb[27].mxu0  ;;  %1051 = vmatpush3.bf16.msra.mxu1 %v1542_v59  ;;  %v585_v26 = vmax.f32 %v537_v12, 0.0  ;;  %v657_v12 = vpop.permute.xlu1 %656 }
 0x111   :  { %v532_v19 = vadd.f32 %v531_v13, %v1526_v21  ;;  %1052 = vmatprep.subr.bf16.mxu1 %v618_v10  ;;  %v583_v41 = vmax.f32 %v529_v17, 0.0 }
 0x112   :  { %v586_v28 = vmax.f32 %v540_v44, 0.0 }
 0x113   :  { %v584_v29 = vmax.f32 %v532_v19, 0.0 }
 0x114   :  { %v620_v31 = vpack.c.bf16 %v586_v28, %v585_v26  ;;  %1053 = vmatpush3.bf16.msra.mxu1 %v1540_v58 }
 0x115   :  { %v619_v24 = vpack.c.bf16 %v584_v29, %v583_v41  ;;  %v1153_v22 = vpop.f32.mrb[28].mxu0  ;;  %v662_v41 = vpop.permute.xlu0 %661 }
 0x116   :  { %v553_v20 = vadd.f32 %v1153_v22, %v1544_v63  ;;  %v544_v32 = vpop.f32.mrb[29].mxu0  ;;  %v667_v22 = vpop.permute.xlu1 %666 }
 0x117   :  { %v545_v25 = vadd.f32 %v544_v32, %v1532_v38  ;;  %v1154_v30 = vpop.f32.mrb[30].mxu0  ;;  %1054 = vmatprep.subr.bf16.mxu1 %v619_v24  ;;  %v1199_v38 = vld [vmem:[%s1655_s3] ss:$8 sps:$4 sm:$0xff]  }
 0x118   :  { %v556_v59 = vadd.f32 %v1154_v30, %v1546_v6  ;;  %v547_v21 = vpop.f32.mrb[31].mxu0  ;;  %1055 = vmatpush3.bf16.msra.mxu1 %v1550_v27  ;;  %v589_v34 = vmax.f32 %v553_v20, 0.0  ;;  %v1204_v6 = vld [vmem:[%s1655_s3 + $0x10] ss:$8 sps:$4 sm:$0xff]   ;;  %v1207_v27 = vld [vmem:[%s1655_s3 + $0x20] ss:$8 sps:$4 sm:$0xff]  }
 0x119   :  { %v548_v33 = vadd.f32 %v547_v21, %v1536_v42  ;;  %1056 = vmatprep.subr.bf16.mxu1 %v620_v31  ;;  %v587_v58 = vmax.f32 %v545_v25, 0.0  ;;  %v1202_v42 = vld [vmem:[%s1655_s3 + $0x14] ss:$8 sps:$4 sm:$0xff]  }
 0x11a   :  { %v590_v35 = vmax.f32 %v556_v59, 0.0 }
 0x11b   :  { %v588_v23 = vmax.f32 %v548_v33, 0.0 }
 0x11c   :  { %v622_v36 = vpack.c.bf16 %v590_v35, %v589_v34  ;;  %1057 = vmatpush3.bf16.msra.mxu1 %v1548_v18  ;;  %v1205_v18 = vld [vmem:[%s1655_s3 + $0x24] ss:$8 sps:$4 sm:$0xff]   ;;  %v672_v35 = vpop.permute.xlu0 %671 }
 0x11d   :  { %v621_v63 = vpack.c.bf16 %v588_v23, %v587_v58 }
 0x11f   :  { %1058 = vmatprep.subr.bf16.mxu1 %v621_v63  ;;  %v677_v63 = vpop.permute.xlu1 %676 }
 0x120   :  { %1059 = vmatpush3.bf16.msra.mxu1 %v1554_v40  ;;  %v1211_v40 = vld [vmem:[%s1655_s3 + $0x44] ss:$8 sps:$4 sm:$0xff]  }
 0x121   :  { %1060 = vmatprep.subr.bf16.mxu1 %v622_v36 }
 0x124   :  { %1061 = vmatpush3.bf16.msra.mxu1 %v1552_v39  ;;  %v1210_v39 = vld [vmem:[%s1655_s3 + $0x30] ss:$8 sps:$4 sm:$0xff]  }
 0x127   :  { %832 = vmatmul.mubr.bf16.vlgmr.msra.gmra.mrb[0].mxu1 %v1199_v38 }
 0x128   :  { %839 = vmatprep.mubr.bf16.mxu1 %v1202_v42 }
 0x12f   :  { %840 = vmatmul.mubr.bf16.gmra.mrb[4].mxu1 %v1204_v6 }
 0x130   :  { %847 = vmatprep.mubr.bf16.mxu1 %v1205_v18 }
 0x137   :  { %848 = vmatmul.mubr.bf16.gmra.mrb[8].mxu1 %v1207_v27 }
 0x138   :  { %855 = vmatprep.mubr.bf16.mxu1 %v1208_v37 }
 0x13f   :  { %856 = vmatmul.mubr.bf16.gmra.mrb[12].mxu1 %v1210_v39 }
 0x140   :  { %863 = vmatprep.mubr.bf16.mxu1 %v1211_v40 }
 0x147   :  { %864 = vmatmul.mubr.bf16.gmra.mrb[16].mxu1 %v1213_v43  ;;  %v682_v43 = vpop.permute.xlu0 %681 }
 0x148   :  { %871 = vmatprep.mubr.bf16.mxu1 %v1214_v45 }
 0x14f   :  { %872 = vmatmul.mubr.bf16.gmra.mrb[20].mxu1 %v1216_v46 }
 0x150   :  { %879 = vmatprep.mubr.bf16.mxu1 %v1217_v47 }
 0x157   :  { %880 = vmatmul.mubr.bf16.gmra.mrb[24].mxu1 %v1219_v48  ;;  %v687_v48 = vpop.permute.xlu1 %686 }
 0x158   :  { %887 = vmatprep.mubr.bf16.mxu1 %v1220_v49 }
 0x15f   :  { %888 = vmatmul.mubr.bf16.gmra.mrb[28].mxu1 %v1222_v50 }
 0x1fa   :  { %v1062_v52 = vpop.f32.mrb[0].mxu1 }
 0x1fb   :  { %v1063_v53 = vpop.f32.mrb[1].mxu1 }
 0x1fc   :  { %v1064_v54 = vadd.f32 %v1063_v53, %v1062_v52  ;;  %v1065_v55 = vpop.f32.mrb[2].mxu1 }
 0x1fd   :  { %v1066_v57 = vpop.f32.mrb[3].mxu1 }
 0x1fe   :  { %v834_v60 = vadd.f32 %v1064_v54, %v642_v56  ;;  %v1067_v61 = vadd.f32 %v1066_v57, %v1065_v55 }
 0x200   :  { %v837_v8 = vadd.f32 %v1067_v61, %v647_v62  ;;  %v896_v0 = vmax.f32 %v834_v60, 0.0  ;;  %v692_v60 = vpop.permute.xlu0 %691 }
 0x202   :  { %v897_v3 = vmax.f32 %v837_v8, 0.0  ;;  %v1068_v9 = vpop.f32.mrb[4].mxu1 }
 0x203   :  { %v1069_v5 = vpop.f32.mrb[5].mxu1 }
 0x204   :  { %v913_v1 = vpack.c.bf16 %v897_v3, %v896_v0  ;;  %v1070_v2 = vadd.f32 %v1069_v5, %v1068_v9  ;;  %v1071_v4 = vpop.f32.mrb[6].mxu1  ;;  %v697_v0 = vpop.permute.xlu1 %696 }
 0x205   :  { %v1072_v10 = vpop.f32.mrb[7].mxu1 }
 0x206   :  { %v842_v16 = vadd.f32 %v1070_v2, %v652_v7  ;;  %v1073_v11 = vadd.f32 %v1072_v10, %v1071_v4  ;;  %1156 = vmatpush3.bf16.msra.mxu0 %v913_v1 }
 0x207   :  { %1157 = vmatprep.subr.bf16.mxu0 %v1248_v51 }
 0x208   :  { %v845_v14 = vadd.f32 %v1073_v11, %v657_v12  ;;  %v898_v17 = vmax.f32 %v842_v16, 0.0  ;;  %v702_v16 = vpop.permute.xlu0 %701 }
 0x20a   :  { %v899_v15 = vmax.f32 %v845_v14, 0.0  ;;  %v1074_v44 = vpop.f32.mrb[8].mxu1 }
 0x20b   :  { %v1075_v13 = vpop.f32.mrb[9].mxu1 }
 0x20c   :  { %v914_v19 = vpack.c.bf16 %v899_v15, %v898_v17  ;;  %v1076_v26 = vadd.f32 %v1075_v13, %v1074_v44  ;;  %v1077_v28 = vpop.f32.mrb[10].mxu1  ;;  %v707_v17 = vpop.permute.xlu1 %706 }
 0x20d   :  { %v1078_v29 = vpop.f32.mrb[11].mxu1 }
 0x20e   :  { %v850_v31 = vadd.f32 %v1076_v26, %v662_v41  ;;  %v1079_v24 = vadd.f32 %v1078_v29, %v1077_v28  ;;  %1158 = vmatpush3.bf16.msra.mxu0 %v914_v19 }
 0x20f   :  { %1159 = vmatprep.subr.bf16.mxu0 %v1248_v51 }
 0x210   :  { %v853_v20 = vadd.f32 %v1079_v24, %v667_v22  ;;  %v900_v32 = vmax.f32 %v850_v31, 0.0  ;;  %v712_v31 = vpop.permute.xlu0 %711 }
 0x212   :  { %v901_v25 = vmax.f32 %v853_v20, 0.0  ;;  %v1080_v30 = vpop.f32.mrb[12].mxu1 }
 0x213   :  { %v1081_v59 = vpop.f32.mrb[13].mxu1 }
 0x214   :  { %v915_v21 = vpack.c.bf16 %v901_v25, %v900_v32  ;;  %v1082_v33 = vadd.f32 %v1081_v59, %v1080_v30  ;;  %v1083_v34 = vpop.f32.mrb[14].mxu1  ;;  %v717_v32 = vpop.permute.xlu1 %716 }
 0x215   :  { %v1084_v58 = vpop.f32.mrb[15].mxu1 }
 0x216   :  { %v858_v23 = vadd.f32 %v1082_v33, %v672_v35  ;;  %v1085_v36 = vadd.f32 %v1084_v58, %v1083_v34  ;;  %1160 = vmatpush3.bf16.msra.mxu0 %v915_v21  ;;  %v912_v33 = vld [vmem:[%s1657_s5] sm:$0x1]  ;;  %v922_v34 = vstv %s1658_s6 }
 0x217   :  { %1161 = vmatprep.subr.bf16.mxu0 %v1248_v51 }
 0x218   :  { %v861_v38 = vadd.f32 %v1085_v36, %v677_v63  ;;  %v902_v42 = vmax.f32 %v858_v23, 0.0 }
 0x21a   :  { %v903_v6 = vmax.f32 %v861_v38, 0.0  ;;  %v1086_v18 = vpop.f32.mrb[16].mxu1 }
 0x21b   :  { %v1087_v27 = vpop.f32.mrb[17].mxu1 }
 0x21c   :  { %v916_v37 = vpack.c.bf16 %v903_v6, %v902_v42  ;;  %v1088_v39 = vadd.f32 %v1087_v27, %v1086_v18  ;;  %v1089_v40 = vpop.f32.mrb[18].mxu1 }
 0x21d   :  { %v1090_v45 = vpop.f32.mrb[19].mxu1 }
 0x21e   :  { %v866_v46 = vadd.f32 %v1088_v39, %v682_v43  ;;  %v1091_v47 = vadd.f32 %v1090_v45, %v1089_v40  ;;  %1162 = vmatpush3.bf16.msra.mxu0 %v916_v37 }
 0x21f   :  { %1163 = vmatprep.subr.bf16.mxu0 %v1248_v51 }
 0x220   :  { %v869_v49 = vadd.f32 %v1091_v47, %v687_v48  ;;  %v904_v50 = vmax.f32 %v866_v46, 0.0 }
 0x222   :  { %v905_v52 = vmax.f32 %v869_v49, 0.0  ;;  %v1092_v53 = vpop.f32.mrb[20].mxu1 }
 0x223   :  { %v1093_v54 = vpop.f32.mrb[21].mxu1 }
 0x224   :  { %v917_v55 = vpack.c.bf16 %v905_v52, %v904_v50  ;;  %v1094_v56 = vadd.f32 %v1093_v54, %v1092_v53  ;;  %v1095_v57 = vpop.f32.mrb[22].mxu1 }
 0x225   :  { %v1096_v61 = vpop.f32.mrb[23].mxu1 }
 0x226   :  { %v874_v62 = vadd.f32 %v1094_v56, %v692_v60  ;;  %v1097_v8 = vadd.f32 %v1096_v61, %v1095_v57  ;;  %1164 = vmatpush3.bf16.msra.mxu0 %v917_v55 }
 0x227   :  { %1165 = vmatprep.subr.bf16.mxu0 %v1248_v51 }
 0x228   :  { %v877_v3 = vadd.f32 %v1097_v8, %v697_v0  ;;  %v906_v9 = vmax.f32 %v874_v62, 0.0 }
 0x22a   :  { %v907_v5 = vmax.f32 %v877_v3, 0.0  ;;  %v1098_v1 = vpop.f32.mrb[24].mxu1 }
 0x22b   :  { %v1099_v2 = vpop.f32.mrb[25].mxu1 }
 0x22c   :  { %v918_v4 = vpack.c.bf16 %v907_v5, %v906_v9  ;;  %v1100_v7 = vadd.f32 %v1099_v2, %v1098_v1  ;;  %v1101_v10 = vpop.f32.mrb[26].mxu1 }
 0x22d   :  { %v1102_v11 = vpop.f32.mrb[27].mxu1 }
 0x22e   :  { %v882_v12 = vadd.f32 %v1100_v7, %v702_v16  ;;  %v1103_v14 = vadd.f32 %v1102_v11, %v1101_v10  ;;  %1166 = vmatpush3.bf16.msra.mxu0 %v918_v4 }
 0x22f   :  { %1167 = vmatprep.subr.bf16.mxu0 %v1248_v51 }
 0x230   :  { %v885_v15 = vadd.f32 %v1103_v14, %v707_v17  ;;  %v908_v44 = vmax.f32 %v882_v12, 0.0 }
 0x232   :  { %v909_v13 = vmax.f32 %v885_v15, 0.0  ;;  %v1104_v19 = vpop.f32.mrb[28].mxu1 }
 0x233   :  { %v1105_v26 = vpop.f32.mrb[29].mxu1 }
 0x234   :  { %v919_v28 = vpack.c.bf16 %v909_v13, %v908_v44  ;;  %v1106_v41 = vadd.f32 %v1105_v26, %v1104_v19  ;;  %v1107_v29 = vpop.f32.mrb[30].mxu1 }
 0x235   :  { %v1108_v24 = vpop.f32.mrb[31].mxu1 }
 0x236   :  { %v890_v22 = vadd.f32 %v1106_v41, %v712_v31  ;;  %v1109_v20 = vadd.f32 %v1108_v24, %v1107_v29  ;;  %1168 = vmatpush3.bf16.msra.mxu0 %v919_v28 }
 0x237   :  { %1169 = vmatprep.subr.bf16.mxu0 %v1248_v51 }
 0x238   :  { %v893_v25 = vadd.f32 %v1109_v20, %v717_v32  ;;  %v910_v30 = vmax.f32 %v890_v22, 0.0 }
 0x23a   :  { %v911_v59 = vmax.f32 %v893_v25, 0.0 }
 0x23c   :  { %v920_v21 = vpack.c.bf16 %v911_v59, %v910_v30 }
 0x23e   :  { %1170 = vmatpush3.bf16.msra.mxu0 %v920_v21 }
 0x241   :  { %1172 = vmatmul.mubr.bf16.vlgmr.msra.gmra.mrb[32].mxu0 %v912_v33 }
 0x314   :  { %v957_v35 = vpop.f32.mrb[32].mxu0 }
 0x315   :  { %v958_v58 = vadd.f32 %v957_v35, %v922_v34  ;;  %v1173_v23 = vpop.f32.mrb[33].mxu0 }
 0x316   :  { %v960_v51 = vpop.f32.mrb[34].mxu0 }
 0x317   :  { %963 = vst [vmem:[#allocation3] sm:$0x1] %v958_v58  ;;  %v1174_v36 = vpop.f32.mrb[35].mxu0 }
 0x318   :  { %1234 = shalt.err (!%p1231_p4)
}
 0x319   :  { %s1235_s6 = scalar_lea.hbm %s1659_s7, 16 }
 0x31a   :  { %p1236_p5 = scmp.ne.s32.totalorder %s1659_s7, %s1235_s6  ;;  %p1239_p6 = scmp.lt.u32.totalorder %s1235_s6, %s1659_s7 }
 0x31c   :  { %p1241_p7 = pnand %p1239_p6, %p1236_p5 }
 0x31e   :  { %1244 = shalt.err (!%p1241_p7)
}
 0x31f   :  { %973 = dma.vmem_to_hbm [thread:$0]  %s971_s16, 16, %s1659_s7, [#allocation4]  }
 0x320   :  { %1245 = dma.done.wait [#allocation4], 16  }
 0x321   :  { %1246 = vsyncadd [#allocation4], 4294967280 }
 0x322   :  { %977 = vsyncpa [#allocation4], 1 }

</bundles_post_ra>
